<compile_context>
chip_gen: v5e
topology: v5e:2x2
jax: 0.10.0
libtpu: 0.0.40
codegen_flags: <defaults>
</compile_context>

<pallas_src>
import numpy as np
import jax
import jax.numpy as jnp
from jax.experimental import pallas as pl
from jax.experimental.pallas import tpu as pltpu


# -----------------------------------------------------------------------------
# Primary: zero-copy identity (no HBM traffic, just launch overhead).
# -----------------------------------------------------------------------------
def _touch_kernel(x_ref, o_ref):
    # Entire DeepLabV3.forward: return x. The output HBM buffer aliases the
    # input buffer, so its contents are already correct; just pin a dependency
    # on it so ordering is preserved and the call is not removed.
    del x_ref
    pltpu.touch(o_ref)


def _zero_copy_identity(x: jax.Array) -> jax.Array:
    return pl.pallas_call(
        _touch_kernel,
        out_shape=jax.ShapeDtypeStruct(x.shape, x.dtype),
        in_specs=[pl.BlockSpec(memory_space=pl.ANY)],
        out_specs=pl.BlockSpec(memory_space=pl.ANY),
        input_output_aliases={0: 0},
        compiler_params=pltpu.CompilerParams(has_side_effects=True),
        cost_estimate=pl.CostEstimate(flops=0, transcendentals=0,
                                      bytes_accessed=0),
    )(x)


# -----------------------------------------------------------------------------
# Fallback: hardened lane-dense streaming copy (HBM -> VMEM -> HBM).
# -----------------------------------------------------------------------------
_LANE_WIDTHS = (8192, 4096, 2048, 1024, 512, 256, 128)   # widest first
_TILE_BYTES_CAP = 8 * 1024 * 1024      # per tile; x4 double-buffered = 32 MiB
_VMEM_LIMIT_BYTES = 48 * 1024 * 1024   # below v7x's 64 MiB physical VMEM


def _copy_kernel(x_ref, o_ref):
    o_ref[...] = x_ref[...]


def _lane_dense_view(total: int):
    """Pick (rows, width) with width a large multiple of 128 (lane-dense)."""
    for width in _LANE_WIDTHS:
        if total % width == 0:
            return total // width, width
    return None


def _pick_block_rows(rows: int, width: int, itemsize: int) -> int:
    if rows <= 8:
        return rows                           # full extent: always legal
    cap = max(8, (_TILE_BYTES_CAP // (width * itemsize)) // 8 * 8)
    block = min((rows // 8) * 8, cap)         # multiple of 8
    if block >= rows and rows >= 16:
        # Force >= 2 grid steps so ("parallel",) shards the copy across v7x's
        # two TensorCores (harmless no-op on single-TC v5e/v6e).
        block = max(8, (((rows + 1) // 2) + 7) // 8 * 8)
    return block


def _streaming_identity(x: jax.Array) -> jax.Array:
    orig_shape = x.shape
    total = x.size
    itemsize = jnp.dtype(x.dtype).itemsize

    factor = _lane_dense_view(total)
    pad = 0
    if factor is None:
        # Keep stores lane-dense: pad the flat view up to a multiple of 128
        # and slice the pad off afterwards (never masked partial stores, never
        # a single whole-array VMEM-busting block).
        width = 128
        rows = (total + width - 1) // width
        pad = rows * width - total
        x2d = jnp.pad(x.reshape(-1), (0, pad)).reshape(rows, width)
    else:
        rows, width = factor
        x2d = x.reshape(rows, width)          # metadata-only reshape

    block_rows = _pick_block_rows(rows, width, itemsize)
    grid = (pl.cdiv(rows, block_rows),)

    out2d = pl.pallas_call(
        _copy_kernel,
        out_shape=jax.ShapeDtypeStruct((rows, width), x.dtype),
        grid_spec=pl.GridSpec(
            grid=grid,
            in_specs=[pl.BlockSpec((block_rows, width), lambda i: (i, 0))],
            out_specs=pl.BlockSpec((block_rows, width), lambda i: (i, 0)),
        ),
        compiler_params=pltpu.CompilerParams(
            dimension_semantics=("parallel",),
            vmem_limit_bytes=_VMEM_LIMIT_BYTES,
        ),
        cost_estimate=pl.CostEstimate(flops=0, transcendentals=0,
                                      bytes_accessed=2 * total * itemsize),
        input_output_aliases={0: 0},
    )(x2d)

    out = out2d.reshape(-1)
    if pad:
        out = out[:total]
    return out.reshape(orig_shape)


# -----------------------------------------------------------------------------
# Public wrapper.
# -----------------------------------------------------------------------------
# Donation is required for input_output_aliases to actually reuse x's HBM
# buffer; without it XLA inserts a defensive copy of x before the kernel.
# Callers must NOT reuse `x` after calling deeplabv3_forward.
_zero_copy_jit = jax.jit(_zero_copy_identity, donate_argnums=(0,))
_streaming_jit = jax.jit(_streaming_identity, donate_argnums=(0,))

_ZERO_COPY_OK = None  # cached result of the one-time compile check


def deeplabv3_forward(x: jax.Array) -> jax.Array:
    """Pallas implementation of DeepLabV3.forward (identity). Donates x."""
    global _ZERO_COPY_OK
    if _ZERO_COPY_OK is None:
        try:
            # AOT compile check on abstract args (does not consume x).
            _zero_copy_jit.lower(
                jax.ShapeDtypeStruct(x.shape, x.dtype)).compile()
            _ZERO_COPY_OK = True
        except Exception:
            _ZERO_COPY_OK = False
    if _ZERO_COPY_OK:
        return _zero_copy_jit(x)
    return _streaming_jit(x)


if __name__ == "__main__":
    # DeepLabV3.__init__ defines no parameters; only the input is needed.
    key = jax.random.PRNGKey(0)
    x = jax.random.normal(key, (2, 4, 16, 16), dtype=jnp.float32)  # NCHW

    # Host copy for verification: x is donated to the kernel (so the aliased
    # output can reuse its HBM buffer) and must not be read afterwards.
    x_host = np.asarray(jax.device_get(x))

    y = deeplabv3_forward(x)
    y = jax.block_until_ready(y)

    assert y.shape == x_host.shape and y.dtype == x_host.dtype
    assert bool((np.asarray(jax.device_get(y)) == x_host).all())
    print("KERNEL_OK")
</pallas_src>

<mosaic_0001>
module attributes {stable_mosaic.version = 11 : i64} {
  func.func @_copy_kernel(%arg0: i32, %arg1: memref<1x2048xf32, #tpu.memory_space<vmem>>, %arg2: memref<1x2048xf32, #tpu.memory_space<vmem>>) attributes {dimension_semantics = [#tpu.dimension_semantics<parallel>], iteration_bounds = array<i64: 1>, scalar_prefetch = 0 : i64, scratch_operands = 0 : i64, tpu.core_type = #tpu.core_type<tc>, window_params = [{transform_indices = @transform_0, window_bounds = array<i64: 1, 2048>}, {transform_indices = @transform_1, window_bounds = array<i64: 1, 2048>}]} {
    %c0 = arith.constant 0 : index
    %c0_0 = arith.constant 0 : index
    %0 = vector.load %arg1[%c0, %c0_0] : memref<1x2048xf32, #tpu.memory_space<vmem>>, vector<1x2048xf32>
    %c0_1 = arith.constant 0 : index
    %c0_2 = arith.constant 0 : index
    %1 = vector.load %arg2[%c0_1, %c0_2] : memref<1x2048xf32, #tpu.memory_space<vmem>>, vector<1x2048xf32>
    tpu.vector_store %arg2[%c0_1, %c0_2], %0 {strides = array<i32>} : memref<1x2048xf32, #tpu.memory_space<vmem>>, vector<1x2048xf32>,
    return
  }
  func.func @transform_0(%arg0: i32) -> (i32, i32) {
    %c0_i32 = arith.constant 0 : i32
    %c0_i32_0 = arith.constant 0 : i32
    return %arg0, %c0_i32 : i32, i32
  }
  func.func @transform_1(%arg0: i32) -> (i32, i32) {
    %c0_i32 = arith.constant 0 : i32
    %c0_i32_0 = arith.constant 0 : i32
    return %arg0, %c0_i32 : i32, i32
  }
}

</mosaic_0001>

<bundles_post_ra>
// kernel: _streaming_identity.1
= control target key start
LH: loop header
LB: loop body
LE: loop exit
PB: predicated region body
PF: predicated region fallthrough
CT: control target
= control target key end

     0   :  { %s38_s0 = inlined_call_operand.vmem [shape: f32[1,2048], index: 0, kind: input, shape index: {}, may-alias: {0,1}]   ;;  %s39_s1 = inlined_call_operand.vmem [shape: f32[1,2048], index: 1, kind: output, shape index: {}, may-alias: {0,1}]  }
   0x1   :  { %v8_v0 = vld [vmem:[%s38_s0] sm:$0xff]  ;;  %v9_v1 = vld [vmem:[%s38_s0 + $0x8] sm:$0xff] }
   0x2   :  { %10 = vst [vmem:[%s39_s1] sm:$0xff] %v8_v0 }
   0x3   :  { %11 = vst [vmem:[%s39_s1 + $0x8] sm:$0xff] %v9_v1 }

</bundles_post_ra>
